<compile_context>
chip_gen: v5e
topology: v5e:2x2
jax: 0.10.0
libtpu: 0.0.40
codegen_flags: <defaults>
</compile_context>

<pallas_src>
import numpy as np
import jax
import jax.numpy as jnp
from jax.experimental import pallas as pl
from jax.experimental.pallas import tpu as pltpu


def _halo_masks_expanded(H, W, Ch, dtype):
    """(9, Ch, H*W) 0/1 masks implementing the padding=1 zero halo (tap-major).

    Pre-expanded along the channel (sublane) axis so the in-kernel multiply is
    a plain aligned load instead of a per-tap broadcast.
    """
    hh = np.arange(H * W) // W
    ww = np.arange(H * W) % W
    masks = np.empty((9, H * W), np.float32)
    t = 0
    for kh in range(3):
        for kw in range(3):
            dh, dw = kh - 1, kw - 1
            valid = ((hh + dh >= 0) & (hh + dh < H) &
                     (ww + dw >= 0) & (ww + dw < W))
            masks[t] = valid.astype(np.float32)
            t += 1
    masks = np.broadcast_to(masks[:, None, :], (9, Ch, H * W)).copy()
    return jnp.asarray(masks, dtype=dtype)


def _make_fusion_kernel(num_feats, Nb, Ch, Cout, H, W):
    HW = H * W
    taps = [(kh - 1, kw - 1) for kh in range(3) for kw in range(3)]

    def kernel(*refs):
        feat_refs = refs[:num_feats]            # each (Nb, Ch, HW)
        w_ref = refs[num_feats]                 # (num_feats*9, Cout, Ch)
        b_ref = refs[num_feats + 1]             # (Cout, 1) f32
        m_ref = refs[num_feats + 2]             # (9, Ch, HW) halo masks
        o_ref = refs[num_feats + 3]             # (Nb, Cout, HW)

        # Bias lane-broadcast, hoisted: done once per grid step, not per image.
        bias_row = jnp.broadcast_to(b_ref[...], (Cout, HW)).astype(jnp.float32)

        # Static unroll over the Nb images packed into this grid step.
        for b in range(Nb):
            acc = bias_row
            for m in range(num_feats):
                x = feat_refs[m][b]             # (Ch, HW), lane-dense spatial
                for t, (dh, dw) in enumerate(taps):
                    delta = dh * W + dw
                    if delta == 0:
                        shifted = x
                    else:
                        # shifted[:, p] == x[:, p + delta]; wrap-around lanes
                        # are exactly the halo positions and get masked to 0.
                        shifted = pltpu.roll(x, shift=(-delta) % HW, axis=1)
                    if dh != 0 or dw != 0:
                        shifted = shifted * m_ref[t]          # aligned (Ch,HW)
                    # Accumulated per-(modality, tap) MXU dot: no channel/tap
                    # concatenation => no sublane relayout, no im2col slab.
                    acc = acc + jnp.dot(w_ref[m * 9 + t], shifted,
                                        preferred_element_type=jnp.float32)
            # ReLU + lane-dense (Cout, HW>=128) unmasked store.
            o_ref[b] = jnp.maximum(acc, 0.0).astype(o_ref.dtype)

    return kernel


def _pick_images_per_step(N, Cin, Cout, HW, itemsize):
    """Choose Nb (images per grid step).

    Amortize per-step overhead, but (a) keep double-buffered in/out blocks well
    inside a conservative VMEM budget (v7x: 64 MiB physical / ~32 MiB scoped),
    and (b) keep >= 2 grid steps so v7x's two TensorCores both get work.
    """
    budget = 12 * 1024 * 1024                       # block budget w/ headroom
    per_img = 2 * itemsize * HW * (Cin + Cout)      # double-buffered in + out
    nb = max(1, budget // per_img)
    nb = min(nb, 8)                                 # bound in-kernel unroll
    if N >= 2:
        nb = min(nb, -(-N // 2))                    # grid length >= 2 (v7x)
    return max(1, min(nb, N))


def fusion_forward(features_nchw, weight_oihw, bias, *, images_per_step=None):
    """features_nchw: list of (N, Ch, H, W) arrays (PyTorch NCHW layout).

    Returns ReLU(Conv2d_3x3_pad1(cat(features, dim=1))) of shape (N, Cout, H, W).
    """
    num_feats = len(features_nchw)
    channels = [int(f.shape[1]) for f in features_nchw]
    assert len(set(channels)) == 1, "modalities must share channel count"
    N, Ch, H, W = features_nchw[0].shape
    Cin = num_feats * Ch
    Cout = int(weight_oihw.shape[0])
    HW = H * W
    dtype = features_nchw[0].dtype
    itemsize = jnp.dtype(dtype).itemsize

    Nb = images_per_step or _pick_images_per_step(N, Cin, Cout, HW, itemsize)
    Np = -(-N // Nb) * Nb                 # pad batch up to a multiple of Nb
    grid = Np // Nb

    # Free contiguous views: NCHW -> (N, Ch, H*W); zero-pad the batch if needed
    # (padded images are sliced off after the call).
    feats = []
    for f in features_nchw:
        f3 = f.reshape(N, Ch, HW)
        if Np != N:
            f3 = jnp.pad(f3, ((0, Np - N), (0, 0), (0, 0)))
        feats.append(f3)

    # OIHW -> per-(modality, tap) weight tiles (num_feats*9, Cout, Ch), ordered
    # m*9 + kh*3 + kw to match the in-kernel tap loop.
    w_r = jnp.transpose(weight_oihw.reshape(Cout, num_feats, Ch, 3, 3),
                        (1, 3, 4, 0, 2)).reshape(num_feats * 9, Cout, Ch)
    w_r = w_r.astype(dtype)
    b2 = bias.reshape(Cout, 1).astype(jnp.float32)
    masks = _halo_masks_expanded(H, W, Ch, dtype)
    # TODO(synk): cast w_r / shifted taps to bf16 on v6e/v7x when channel
    # counts grow and accuracy allows (keep preferred_element_type=f32).

    kernel = _make_fusion_kernel(num_feats, Nb, Ch, Cout, H, W)

    in_specs = [pl.BlockSpec((Nb, Ch, HW), lambda n: (n, 0, 0))
                for _ in range(num_feats)]
    in_specs += [
        pl.BlockSpec((num_feats * 9, Cout, Ch), lambda n: (0, 0, 0)),  # weights
        pl.BlockSpec((Cout, 1), lambda n: (0, 0)),                     # bias
        pl.BlockSpec((9, Ch, HW), lambda n: (0, 0, 0)),                # masks
    ]

    flops = 2 * Np * Cout * 9 * Cin * HW
    bytes_accessed = (itemsize * Np * HW * (Cin + Cout)
                      + w_r.size * itemsize + masks.size * itemsize
                      + b2.size * 4)
    cost = pl.CostEstimate(flops=flops, transcendentals=0,
                           bytes_accessed=int(bytes_accessed))

    out = pl.pallas_call(
        kernel,
        out_shape=jax.ShapeDtypeStruct((Np, Cout, HW), dtype),
        grid_spec=pltpu.PrefetchScalarGridSpec(
            num_scalar_prefetch=0,
            grid=(grid,),
            in_specs=in_specs,
            out_specs=pl.BlockSpec((Nb, Cout, HW), lambda n: (n, 0, 0)),
        ),
        compiler_params=pltpu.CompilerParams(
            dimension_semantics=("parallel",),
            # Raise the scoped-VMEM cap explicitly (v5e default is 16 MiB);
            # Nb is sized so the blocks stay well under this on every gen.
            vmem_limit_bytes=32 * 1024 * 1024,
        ),
        cost_estimate=cost,
    )(*feats, w_r, b2, masks)

    # Drop batch padding; free contiguous view back to NCHW.
    return out[:N].reshape(N, Cout, H, W)


def _reference(features, weight, bias):
    x = jnp.concatenate(features, axis=1)
    y = jax.lax.conv_general_dilated(
        x, weight, window_strides=(1, 1), padding=((1, 1), (1, 1)),
        dimension_numbers=("NCHW", "OIHW", "NCHW"))
    return jnp.maximum(y + bias[None, :, None, None], 0.0)


if __name__ == "__main__":
    # Small shapes consistent with the module: num_modalities=2,
    # hidden_channels=4, batch=2, spatial=16x16.
    num_modalities = 2
    hidden_channels = 4
    N, H, W = 2, 16, 16
    Cin = num_modalities * hidden_channels
    Cout = hidden_channels

    key = jax.random.PRNGKey(0)
    k_feats, k_w, k_b = jax.random.split(key, 3)

    feat_keys = jax.random.split(k_feats, num_modalities)
    features = [
        jax.random.normal(feat_keys[m], (N, hidden_channels, H, W), jnp.float32)
        for m in range(num_modalities)
    ]
    weight = 0.1 * jax.random.normal(k_w, (Cout, Cin, 3, 3), jnp.float32)
    bias = 0.1 * jax.random.normal(k_b, (Cout,), jnp.float32)

    out = fusion_forward(features, weight, bias)
    out = jax.block_until_ready(out)
    ref = _reference(features, weight, bias)
    assert out.shape == (N, Cout, H, W)
    assert jnp.allclose(out, ref, atol=2e-4, rtol=2e-4)

    # Second check: odd batch (N=5) exercises Nb>1 packing + batch padding.
    N2 = 5
    feat_keys2 = jax.random.split(jax.random.PRNGKey(7), num_modalities)
    features2 = [
        jax.random.normal(feat_keys2[m], (N2, hidden_channels, H, W), jnp.float32)
        for m in range(num_modalities)
    ]
    out2 = jax.block_until_ready(fusion_forward(features2, weight, bias))
    ref2 = _reference(features2, weight, bias)
    assert out2.shape == (N2, Cout, H, W)
    assert jnp.allclose(out2, ref2, atol=2e-4, rtol=2e-4)

    print("KERNEL_OK")
</pallas_src>

<mosaic_0001>
module attributes {stable_mosaic.version = 11 : i64} {
  func.func @kernel(%arg0: i32, %arg1: memref<1x4x256xf32, #tpu.memory_space<vmem>>, %arg2: memref<1x4x256xf32, #tpu.memory_space<vmem>>, %arg3: memref<18x4x4xf32, #tpu.memory_space<vmem>>, %arg4: memref<4x1xf32, #tpu.memory_space<vmem>>, %arg5: memref<9x4x256xf32, #tpu.memory_space<vmem>>, %arg6: memref<1x4x256xf32, #tpu.memory_space<vmem>>) attributes {dimension_semantics = [#tpu.dimension_semantics<parallel>], iteration_bounds = array<i64: 2>, scalar_prefetch = 0 : i64, scratch_operands = 0 : i64, tpu.core_type = #tpu.core_type<tc>, window_params = [{transform_indices = @transform_0, window_bounds = array<i64: 1, 4, 256>}, {transform_indices = @transform_1, window_bounds = array<i64: 1, 4, 256>}, {pipeline_mode = #tpu.pipeline_mode<synchronous>, transform_indices = @transform_2, window_bounds = array<i64: 18, 4, 4>}, {pipeline_mode = #tpu.pipeline_mode<synchronous>, transform_indices = @transform_3, window_bounds = array<i64: 4, 1>}, {pipeline_mode = #tpu.pipeline_mode<synchronous>, transform_indices = @transform_4, window_bounds = array<i64: 9, 4, 256>}, {transform_indices = @transform_5, window_bounds = array<i64: 1, 4, 256>}]} {
    %c0 = arith.constant 0 : index
    %c0_0 = arith.constant 0 : index
    %0 = vector.load %arg4[%c0, %c0_0] : memref<4x1xf32, #tpu.memory_space<vmem>>, vector<4x1xf32>
    %1 = vector.shape_cast %0 : vector<4x1xf32> to vector<4x1xf32>
    %2 = vector.broadcast %1 : vector<4x1xf32> to vector<4x256xf32>
    %c0_1 = arith.constant 0 : index
    %c0_2 = arith.constant 0 : index
    %c0_3 = arith.constant 0 : index
    %3 = vector.load %arg1[%c0_1, %c0_2, %c0_3] : memref<1x4x256xf32, #tpu.memory_space<vmem>>, vector<1x4x256xf32>
    %4 = vector.shape_cast %3 : vector<1x4x256xf32> to vector<4x256xf32>
    %c17_i32 = arith.constant 17 : i32
    %5 = tpu.dynamic_rotate %4 by %c17_i32 dim 1 : vector<4x256xf32>, i32 -> vector<4x256xf32>
    %c0_4 = arith.constant 0 : index
    %c0_5 = arith.constant 0 : index
    %c0_6 = arith.constant 0 : index
    %6 = vector.load %arg5[%c0_4, %c0_5, %c0_6] : memref<9x4x256xf32, #tpu.memory_space<vmem>>, vector<1x4x256xf32>
    %7 = vector.shape_cast %6 : vector<1x4x256xf32> to vector<4x256xf32>
    %8 = arith.mulf %5, %7 : vector<4x256xf32>
    %c0_7 = arith.constant 0 : index
    %c0_8 = arith.constant 0 : index
    %c0_9 = arith.constant 0 : index
    %9 = vector.load %arg3[%c0_7, %c0_8, %c0_9] : memref<18x4x4xf32, #tpu.memory_space<vmem>>, vector<1x4x4xf32>
    %10 = vector.shape_cast %9 : vector<1x4x4xf32> to vector<4x4xf32>
    %cst = arith.constant dense<0.000000e+00> : vector<4x256xf32>
    %11 = tpu.matmul %10, %8, %cst {dimension_numbers = #tpu.dot_dimension_numbers<[1], [0], [0], [1], [0, 0, 1, 1], [], []>} : vector<4x4xf32>, vector<4x256xf32>, vector<4x256xf32> -> vector<4x256xf32>
    %12 = arith.addf %2, %11 : vector<4x256xf32>
    %c16_i32 = arith.constant 16 : i32
    %13 = tpu.dynamic_rotate %4 by %c16_i32 dim 1 : vector<4x256xf32>, i32 -> vector<4x256xf32>
    %c1 = arith.constant 1 : index
    %c0_10 = arith.constant 0 : index
    %c0_11 = arith.constant 0 : index
    %14 = vector.load %arg5[%c1, %c0_10, %c0_11] : memref<9x4x256xf32, #tpu.memory_space<vmem>>, vector<1x4x256xf32>
    %15 = vector.shape_cast %14 : vector<1x4x256xf32> to vector<4x256xf32>
    %16 = arith.mulf %13, %15 : vector<4x256xf32>
    %c1_12 = arith.constant 1 : index
    %c0_13 = arith.constant 0 : index
    %c0_14 = arith.constant 0 : index
    %17 = vector.load %arg3[%c1_12, %c0_13, %c0_14] : memref<18x4x4xf32, #tpu.memory_space<vmem>>, vector<1x4x4xf32>
    %18 = vector.shape_cast %17 : vector<1x4x4xf32> to vector<4x4xf32>
    %cst_15 = arith.constant dense<0.000000e+00> : vector<4x256xf32>
    %19 = tpu.matmul %18, %16, %cst_15 {dimension_numbers = #tpu.dot_dimension_numbers<[1], [0], [0], [1], [0, 0, 1, 1], [], []>} : vector<4x4xf32>, vector<4x256xf32>, vector<4x256xf32> -> vector<4x256xf32>
    %20 = arith.addf %12, %19 : vector<4x256xf32>
    %c15_i32 = arith.constant 15 : i32
    %21 = tpu.dynamic_rotate %4 by %c15_i32 dim 1 : vector<4x256xf32>, i32 -> vector<4x256xf32>
    %c2 = arith.constant 2 : index
    %c0_16 = arith.constant 0 : index
    %c0_17 = arith.constant 0 : index
    %22 = vector.load %arg5[%c2, %c0_16, %c0_17] : memref<9x4x256xf32, #tpu.memory_space<vmem>>, vector<1x4x256xf32>
    %23 = vector.shape_cast %22 : vector<1x4x256xf32> to vector<4x256xf32>
    %24 = arith.mulf %21, %23 : vector<4x256xf32>
    %c2_18 = arith.constant 2 : index
    %c0_19 = arith.constant 0 : index
    %c0_20 = arith.constant 0 : index
    %25 = vector.load %arg3[%c2_18, %c0_19, %c0_20] : memref<18x4x4xf32, #tpu.memory_space<vmem>>, vector<1x4x4xf32>
    %26 = vector.shape_cast %25 : vector<1x4x4xf32> to vector<4x4xf32>
    %cst_21 = arith.constant dense<0.000000e+00> : vector<4x256xf32>
    %27 = tpu.matmul %26, %24, %cst_21 {dimension_numbers = #tpu.dot_dimension_numbers<[1], [0], [0], [1], [0, 0, 1, 1], [], []>} : vector<4x4xf32>, vector<4x256xf32>, vector<4x256xf32> -> vector<4x256xf32>
    %28 = arith.addf %20, %27 : vector<4x256xf32>
    %c1_i32 = arith.constant 1 : i32
    %29 = tpu.dynamic_rotate %4 by %c1_i32 dim 1 : vector<4x256xf32>, i32 -> vector<4x256xf32>
    %c3 = arith.constant 3 : index
    %c0_22 = arith.constant 0 : index
    %c0_23 = arith.constant 0 : index
    %30 = vector.load %arg5[%c3, %c0_22, %c0_23] : memref<9x4x256xf32, #tpu.memory_space<vmem>>, vector<1x4x256xf32>
    %31 = vector.shape_cast %30 : vector<1x4x256xf32> to vector<4x256xf32>
    %32 = arith.mulf %29, %31 : vector<4x256xf32>
    %c3_24 = arith.constant 3 : index
    %c0_25 = arith.constant 0 : index
    %c0_26 = arith.constant 0 : index
    %33 = vector.load %arg3[%c3_24, %c0_25, %c0_26] : memref<18x4x4xf32, #tpu.memory_space<vmem>>, vector<1x4x4xf32>
    %34 = vector.shape_cast %33 : vector<1x4x4xf32> to vector<4x4xf32>
    %cst_27 = arith.constant dense<0.000000e+00> : vector<4x256xf32>
    %35 = tpu.matmul %34, %32, %cst_27 {dimension_numbers = #tpu.dot_dimension_numbers<[1], [0], [0], [1], [0, 0, 1, 1], [], []>} : vector<4x4xf32>, vector<4x256xf32>, vector<4x256xf32> -> vector<4x256xf32>
    %36 = arith.addf %28, %35 : vector<4x256xf32>
    %c4 = arith.constant 4 : index
    %c0_28 = arith.constant 0 : index
    %c0_29 = arith.constant 0 : index
    %37 = vector.load %arg3[%c4, %c0_28, %c0_29] : memref<18x4x4xf32, #tpu.memory_space<vmem>>, vector<1x4x4xf32>
    %38 = vector.shape_cast %37 : vector<1x4x4xf32> to vector<4x4xf32>
    %cst_30 = arith.constant dense<0.000000e+00> : vector<4x256xf32>
    %39 = tpu.matmul %38, %4, %cst_30 {dimension_numbers = #tpu.dot_dimension_numbers<[1], [0], [0], [1], [0, 0, 1, 1], [], []>} : vector<4x4xf32>, vector<4x256xf32>, vector<4x256xf32> -> vector<4x256xf32>
    %40 = arith.addf %36, %39 : vector<4x256xf32>
    %c255_i32 = arith.constant 255 : i32
    %41 = tpu.dynamic_rotate %4 by %c255_i32 dim 1 : vector<4x256xf32>, i32 -> vector<4x256xf32>
    %c5 = arith.constant 5 : index
    %c0_31 = arith.constant 0 : index
    %c0_32 = arith.constant 0 : index
    %42 = vector.load %arg5[%c5, %c0_31, %c0_32] : memref<9x4x256xf32, #tpu.memory_space<vmem>>, vector<1x4x256xf32>
    %43 = vector.shape_cast %42 : vector<1x4x256xf32> to vector<4x256xf32>
    %44 = arith.mulf %41, %43 : vector<4x256xf32>
    %c5_33 = arith.constant 5 : index
    %c0_34 = arith.constant 0 : index
    %c0_35 = arith.constant 0 : index
    %45 = vector.load %arg3[%c5_33, %c0_34, %c0_35] : memref<18x4x4xf32, #tpu.memory_space<vmem>>, vector<1x4x4xf32>
    %46 = vector.shape_cast %45 : vector<1x4x4xf32> to vector<4x4xf32>
    %cst_36 = arith.constant dense<0.000000e+00> : vector<4x256xf32>
    %47 = tpu.matmul %46, %44, %cst_36 {dimension_numbers = #tpu.dot_dimension_numbers<[1], [0], [0], [1], [0, 0, 1, 1], [], []>} : vector<4x4xf32>, vector<4x256xf32>, vector<4x256xf32> -> vector<4x256xf32>
    %48 = arith.addf %40, %47 : vector<4x256xf32>
    %c241_i32 = arith.constant 241 : i32
    %49 = tpu.dynamic_rotate %4 by %c241_i32 dim 1 : vector<4x256xf32>, i32 -> vector<4x256xf32>
    %c6 = arith.constant 6 : index
    %c0_37 = arith.constant 0 : index
    %c0_38 = arith.constant 0 : index
    %50 = vector.load %arg5[%c6, %c0_37, %c0_38] : memref<9x4x256xf32, #tpu.memory_space<vmem>>, vector<1x4x256xf32>
    %51 = vector.shape_cast %50 : vector<1x4x256xf32> to vector<4x256xf32>
    %52 = arith.mulf %49, %51 : vector<4x256xf32>
    %c6_39 = arith.constant 6 : index
    %c0_40 = arith.constant 0 : index
    %c0_41 = arith.constant 0 : index
    %53 = vector.load %arg3[%c6_39, %c0_40, %c0_41] : memref<18x4x4xf32, #tpu.memory_space<vmem>>, vector<1x4x4xf32>
    %54 = vector.shape_cast %53 : vector<1x4x4xf32> to vector<4x4xf32>
    %cst_42 = arith.constant dense<0.000000e+00> : vector<4x256xf32>
    %55 = tpu.matmul %54, %52, %cst_42 {dimension_numbers = #tpu.dot_dimension_numbers<[1], [0], [0], [1], [0, 0, 1, 1], [], []>} : vector<4x4xf32>, vector<4x256xf32>, vector<4x256xf32> -> vector<4x256xf32>
    %56 = arith.addf %48, %55 : vector<4x256xf32>
    %c240_i32 = arith.constant 240 : i32
    %57 = tpu.dynamic_rotate %4 by %c240_i32 dim 1 : vector<4x256xf32>, i32 -> vector<4x256xf32>
    %c7 = arith.constant 7 : index
    %c0_43 = arith.constant 0 : index
    %c0_44 = arith.constant 0 : index
    %58 = vector.load %arg5[%c7, %c0_43, %c0_44] : memref<9x4x256xf32, #tpu.memory_space<vmem>>, vector<1x4x256xf32>
    %59 = vector.shape_cast %58 : vector<1x4x256xf32> to vector<4x256xf32>
    %60 = arith.mulf %57, %59 : vector<4x256xf32>
    %c7_45 = arith.constant 7 : index
    %c0_46 = arith.constant 0 : index
    %c0_47 = arith.constant 0 : index
    %61 = vector.load %arg3[%c7_45, %c0_46, %c0_47] : memref<18x4x4xf32, #tpu.memory_space<vmem>>, vector<1x4x4xf32>
    %62 = vector.shape_cast %61 : vector<1x4x4xf32> to vector<4x4xf32>
    %cst_48 = arith.constant dense<0.000000e+00> : vector<4x256xf32>
    %63 = tpu.matmul %62, %60, %cst_48 {dimension_numbers = #tpu.dot_dimension_numbers<[1], [0], [0], [1], [0, 0, 1, 1], [], []>} : vector<4x4xf32>, vector<4x256xf32>, vector<4x256xf32> -> vector<4x256xf32>
    %64 = arith.addf %56, %63 : vector<4x256xf32>
    %c239_i32 = arith.constant 239 : i32
    %65 = tpu.dynamic_rotate %4 by %c239_i32 dim 1 : vector<4x256xf32>, i32 -> vector<4x256xf32>
    %c8 = arith.constant 8 : index
    %c0_49 = arith.constant 0 : index
    %c0_50 = arith.constant 0 : index
    %66 = vector.load %arg5[%c8, %c0_49, %c0_50] : memref<9x4x256xf32, #tpu.memory_space<vmem>>, vector<1x4x256xf32>
    %67 = vector.shape_cast %66 : vector<1x4x256xf32> to vector<4x256xf32>
    %68 = arith.mulf %65, %67 : vector<4x256xf32>
    %c8_51 = arith.constant 8 : index
    %c0_52 = arith.constant 0 : index
    %c0_53 = arith.constant 0 : index
    %69 = vector.load %arg3[%c8_51, %c0_52, %c0_53] : memref<18x4x4xf32, #tpu.memory_space<vmem>>, vector<1x4x4xf32>
    %70 = vector.shape_cast %69 : vector<1x4x4xf32> to vector<4x4xf32>
    %cst_54 = arith.constant dense<0.000000e+00> : vector<4x256xf32>
    %71 = tpu.matmul %70, %68, %cst_54 {dimension_numbers = #tpu.dot_dimension_numbers<[1], [0], [0], [1], [0, 0, 1, 1], [], []>} : vector<4x4xf32>, vector<4x256xf32>, vector<4x256xf32> -> vector<4x256xf32>
    %72 = arith.addf %64, %71 : vector<4x256xf32>
    %c0_55 = arith.constant 0 : index
    %c0_56 = arith.constant 0 : index
    %c0_57 = arith.constant 0 : index
    %73 = vector.load %arg2[%c0_55, %c0_56, %c0_57] : memref<1x4x256xf32, #tpu.memory_space<vmem>>, vector<1x4x256xf32>
    %74 = vector.shape_cast %73 : vector<1x4x256xf32> to vector<4x256xf32>
    %c17_i32_58 = arith.constant 17 : i32
    %75 = tpu.dynamic_rotate %74 by %c17_i32_58 dim 1 : vector<4x256xf32>, i32 -> vector<4x256xf32>
    %c0_59 = arith.constant 0 : index
    %c0_60 = arith.constant 0 : index
    %c0_61 = arith.constant 0 : index
    %76 = vector.load %arg5[%c0_59, %c0_60, %c0_61] : memref<9x4x256xf32, #tpu.memory_space<vmem>>, vector<1x4x256xf32>
    %77 = vector.shape_cast %76 : vector<1x4x256xf32> to vector<4x256xf32>
    %78 = arith.mulf %75, %77 : vector<4x256xf32>
    %c9 = arith.constant 9 : index
    %c0_62 = arith.constant 0 : index
    %c0_63 = arith.constant 0 : index
    %79 = vector.load %arg3[%c9, %c0_62, %c0_63] : memref<18x4x4xf32, #tpu.memory_space<vmem>>, vector<1x4x4xf32>
    %80 = vector.shape_cast %79 : vector<1x4x4xf32> to vector<4x4xf32>
    %cst_64 = arith.constant dense<0.000000e+00> : vector<4x256xf32>
    %81 = tpu.matmul %80, %78, %cst_64 {dimension_numbers = #tpu.dot_dimension_numbers<[1], [0], [0], [1], [0, 0, 1, 1], [], []>} : vector<4x4xf32>, vector<4x256xf32>, vector<4x256xf32> -> vector<4x256xf32>
    %82 = arith.addf %72, %81 : vector<4x256xf32>
    %c16_i32_65 = arith.constant 16 : i32
    %83 = tpu.dynamic_rotate %74 by %c16_i32_65 dim 1 : vector<4x256xf32>, i32 -> vector<4x256xf32>
    %c1_66 = arith.constant 1 : index
    %c0_67 = arith.constant 0 : index
    %c0_68 = arith.constant 0 : index
    %84 = vector.load %arg5[%c1_66, %c0_67, %c0_68] : memref<9x4x256xf32, #tpu.memory_space<vmem>>, vector<1x4x256xf32>
    %85 = vector.shape_cast %84 : vector<1x4x256xf32> to vector<4x256xf32>
    %86 = arith.mulf %83, %85 : vector<4x256xf32>
    %c10 = arith.constant 10 : index
    %c0_69 = arith.constant 0 : index
    %c0_70 = arith.constant 0 : index
    %87 = vector.load %arg3[%c10, %c0_69, %c0_70] : memref<18x4x4xf32, #tpu.memory_space<vmem>>, vector<1x4x4xf32>
    %88 = vector.shape_cast %87 : vector<1x4x4xf32> to vector<4x4xf32>
    %cst_71 = arith.constant dense<0.000000e+00> : vector<4x256xf32>
    %89 = tpu.matmul %88, %86, %cst_71 {dimension_numbers = #tpu.dot_dimension_numbers<[1], [0], [0], [1], [0, 0, 1, 1], [], []>} : vector<4x4xf32>, vector<4x256xf32>, vector<4x256xf32> -> vector<4x256xf32>
    %90 = arith.addf %82, %89 : vector<4x256xf32>
    %c15_i32_72 = arith.constant 15 : i32
    %91 = tpu.dynamic_rotate %74 by %c15_i32_72 dim 1 : vector<4x256xf32>, i32 -> vector<4x256xf32>
    %c2_73 = arith.constant 2 : index
    %c0_74 = arith.constant 0 : index
    %c0_75 = arith.constant 0 : index
    %92 = vector.load %arg5[%c2_73, %c0_74, %c0_75] : memref<9x4x256xf32, #tpu.memory_space<vmem>>, vector<1x4x256xf32>
    %93 = vector.shape_cast %92 : vector<1x4x256xf32> to vector<4x256xf32>
    %94 = arith.mulf %91, %93 : vector<4x256xf32>
    %c11 = arith.constant 11 : index
    %c0_76 = arith.constant 0 : index
    %c0_77 = arith.constant 0 : index
    %95 = vector.load %arg3[%c11, %c0_76, %c0_77] : memref<18x4x4xf32, #tpu.memory_space<vmem>>, vector<1x4x4xf32>
    %96 = vector.shape_cast %95 : vector<1x4x4xf32> to vector<4x4xf32>
    %cst_78 = arith.constant dense<0.000000e+00> : vector<4x256xf32>
    %97 = tpu.matmul %96, %94, %cst_78 {dimension_numbers = #tpu.dot_dimension_numbers<[1], [0], [0], [1], [0, 0, 1, 1], [], []>} : vector<4x4xf32>, vector<4x256xf32>, vector<4x256xf32> -> vector<4x256xf32>
    %98 = arith.addf %90, %97 : vector<4x256xf32>
    %c1_i32_79 = arith.constant 1 : i32
    %99 = tpu.dynamic_rotate %74 by %c1_i32_79 dim 1 : vector<4x256xf32>, i32 -> vector<4x256xf32>
    %c3_80 = arith.constant 3 : index
    %c0_81 = arith.constant 0 : index
    %c0_82 = arith.constant 0 : index
    %100 = vector.load %arg5[%c3_80, %c0_81, %c0_82] : memref<9x4x256xf32, #tpu.memory_space<vmem>>, vector<1x4x256xf32>
    %101 = vector.shape_cast %100 : vector<1x4x256xf32> to vector<4x256xf32>
    %102 = arith.mulf %99, %101 : vector<4x256xf32>
    %c12 = arith.constant 12 : index
    %c0_83 = arith.constant 0 : index
    %c0_84 = arith.constant 0 : index
    %103 = vector.load %arg3[%c12, %c0_83, %c0_84] : memref<18x4x4xf32, #tpu.memory_space<vmem>>, vector<1x4x4xf32>
    %104 = vector.shape_cast %103 : vector<1x4x4xf32> to vector<4x4xf32>
    %cst_85 = arith.constant dense<0.000000e+00> : vector<4x256xf32>
    %105 = tpu.matmul %104, %102, %cst_85 {dimension_numbers = #tpu.dot_dimension_numbers<[1], [0], [0], [1], [0, 0, 1, 1], [], []>} : vector<4x4xf32>, vector<4x256xf32>, vector<4x256xf32> -> vector<4x256xf32>
    %106 = arith.addf %98, %105 : vector<4x256xf32>
    %c13 = arith.constant 13 : index
    %c0_86 = arith.constant 0 : index
    %c0_87 = arith.constant 0 : index
    %107 = vector.load %arg3[%c13, %c0_86, %c0_87] : memref<18x4x4xf32, #tpu.memory_space<vmem>>, vector<1x4x4xf32>
    %108 = vector.shape_cast %107 : vector<1x4x4xf32> to vector<4x4xf32>
    %cst_88 = arith.constant dense<0.000000e+00> : vector<4x256xf32>
    %109 = tpu.matmul %108, %74, %cst_88 {dimension_numbers = #tpu.dot_dimension_numbers<[1], [0], [0], [1], [0, 0, 1, 1], [], []>} : vector<4x4xf32>, vector<4x256xf32>, vector<4x256xf32> -> vector<4x256xf32>
    %110 = arith.addf %106, %109 : vector<4x256xf32>
    %c255_i32_89 = arith.constant 255 : i32
    %111 = tpu.dynamic_rotate %74 by %c255_i32_89 dim 1 : vector<4x256xf32>, i32 -> vector<4x256xf32>
    %c5_90 = arith.constant 5 : index
    %c0_91 = arith.constant 0 : index
    %c0_92 = arith.constant 0 : index
    %112 = vector.load %arg5[%c5_90, %c0_91, %c0_92] : memref<9x4x256xf32, #tpu.memory_space<vmem>>, vector<1x4x256xf32>
    %113 = vector.shape_cast %112 : vector<1x4x256xf32> to vector<4x256xf32>
    %114 = arith.mulf %111, %113 : vector<4x256xf32>
    %c14 = arith.constant 14 : index
    %c0_93 = arith.constant 0 : index
    %c0_94 = arith.constant 0 : index
    %115 = vector.load %arg3[%c14, %c0_93, %c0_94] : memref<18x4x4xf32, #tpu.memory_space<vmem>>, vector<1x4x4xf32>
    %116 = vector.shape_cast %115 : vector<1x4x4xf32> to vector<4x4xf32>
    %cst_95 = arith.constant dense<0.000000e+00> : vector<4x256xf32>
    %117 = tpu.matmul %116, %114, %cst_95 {dimension_numbers = #tpu.dot_dimension_numbers<[1], [0], [0], [1], [0, 0, 1, 1], [], []>} : vector<4x4xf32>, vector<4x256xf32>, vector<4x256xf32> -> vector<4x256xf32>
    %118 = arith.addf %110, %117 : vector<4x256xf32>
    %c241_i32_96 = arith.constant 241 : i32
    %119 = tpu.dynamic_rotate %74 by %c241_i32_96 dim 1 : vector<4x256xf32>, i32 -> vector<4x256xf32>
    %c6_97 = arith.constant 6 : index
    %c0_98 = arith.constant 0 : index
    %c0_99 = arith.constant 0 : index
    %120 = vector.load %arg5[%c6_97, %c0_98, %c0_99] : memref<9x4x256xf32, #tpu.memory_space<vmem>>, vector<1x4x256xf32>
    %121 = vector.shape_cast %120 : vector<1x4x256xf32> to vector<4x256xf32>
    %122 = arith.mulf %119, %121 : vector<4x256xf32>
    %c15 = arith.constant 15 : index
    %c0_100 = arith.constant 0 : index
    %c0_101 = arith.constant 0 : index
    %123 = vector.load %arg3[%c15, %c0_100, %c0_101] : memref<18x4x4xf32, #tpu.memory_space<vmem>>, vector<1x4x4xf32>
    %124 = vector.shape_cast %123 : vector<1x4x4xf32> to vector<4x4xf32>
    %cst_102 = arith.constant dense<0.000000e+00> : vector<4x256xf32>
    %125 = tpu.matmul %124, %122, %cst_102 {dimension_numbers = #tpu.dot_dimension_numbers<[1], [0], [0], [1], [0, 0, 1, 1], [], []>} : vector<4x4xf32>, vector<4x256xf32>, vector<4x256xf32> -> vector<4x256xf32>
    %126 = arith.addf %118, %125 : vector<4x256xf32>
    %c240_i32_103 = arith.constant 240 : i32
    %127 = tpu.dynamic_rotate %74 by %c240_i32_103 dim 1 : vector<4x256xf32>, i32 -> vector<4x256xf32>
    %c7_104 = arith.constant 7 : index
    %c0_105 = arith.constant 0 : index
    %c0_106 = arith.constant 0 : index
    %128 = vector.load %arg5[%c7_104, %c0_105, %c0_106] : memref<9x4x256xf32, #tpu.memory_space<vmem>>, vector<1x4x256xf32>
    %129 = vector.shape_cast %128 : vector<1x4x256xf32> to vector<4x256xf32>
    %130 = arith.mulf %127, %129 : vector<4x256xf32>
    %c16 = arith.constant 16 : index
    %c0_107 = arith.constant 0 : index
    %c0_108 = arith.constant 0 : index
    %131 = vector.load %arg3[%c16, %c0_107, %c0_108] : memref<18x4x4xf32, #tpu.memory_space<vmem>>, vector<1x4x4xf32>
    %132 = vector.shape_cast %131 : vector<1x4x4xf32> to vector<4x4xf32>
    %cst_109 = arith.constant dense<0.000000e+00> : vector<4x256xf32>
    %133 = tpu.matmul %132, %130, %cst_109 {dimension_numbers = #tpu.dot_dimension_numbers<[1], [0], [0], [1], [0, 0, 1, 1], [], []>} : vector<4x4xf32>, vector<4x256xf32>, vector<4x256xf32> -> vector<4x256xf32>
    %134 = arith.addf %126, %133 : vector<4x256xf32>
    %c239_i32_110 = arith.constant 239 : i32
    %135 = tpu.dynamic_rotate %74 by %c239_i32_110 dim 1 : vector<4x256xf32>, i32 -> vector<4x256xf32>
    %c8_111 = arith.constant 8 : index
    %c0_112 = arith.constant 0 : index
    %c0_113 = arith.constant 0 : index
    %136 = vector.load %arg5[%c8_111, %c0_112, %c0_113] : memref<9x4x256xf32, #tpu.memory_space<vmem>>, vector<1x4x256xf32>
    %137 = vector.shape_cast %136 : vector<1x4x256xf32> to vector<4x256xf32>
    %138 = arith.mulf %135, %137 : vector<4x256xf32>
    %c17 = arith.constant 17 : index
    %c0_114 = arith.constant 0 : index
    %c0_115 = arith.constant 0 : index
    %139 = vector.load %arg3[%c17, %c0_114, %c0_115] : memref<18x4x4xf32, #tpu.memory_space<vmem>>, vector<1x4x4xf32>
    %140 = vector.shape_cast %139 : vector<1x4x4xf32> to vector<4x4xf32>
    %cst_116 = arith.constant dense<0.000000e+00> : vector<4x256xf32>
    %141 = tpu.matmul %140, %138, %cst_116 {dimension_numbers = #tpu.dot_dimension_numbers<[1], [0], [0], [1], [0, 0, 1, 1], [], []>} : vector<4x4xf32>, vector<4x256xf32>, vector<4x256xf32> -> vector<4x256xf32>
    %142 = arith.addf %134, %141 : vector<4x256xf32>
    %cst_117 = arith.constant 0.000000e+00 : f32
    %143 = vector.broadcast %cst_117 : f32 to vector<4x256xf32>
    %144 = arith.maximumf %142, %143 : vector<4x256xf32>
    %c0_118 = arith.constant 0 : index
    %c0_119 = arith.constant 0 : index
    %c0_120 = arith.constant 0 : index
    %145 = vector.load %arg6[%c0_118, %c0_119, %c0_120] : memref<1x4x256xf32, #tpu.memory_space<vmem>>, vector<1x4x256xf32>
    %146 = vector.shape_cast %145 : vector<1x4x256xf32> to vector<4x256xf32>
    %147 = vector.shape_cast %144 : vector<4x256xf32> to vector<1x4x256xf32>
    tpu.vector_store %arg6[%c0_118, %c0_119, %c0_120], %147 {strides = array<i32>} : memref<1x4x256xf32, #tpu.memory_space<vmem>>, vector<1x4x256xf32>,
    return
  }
  func.func @transform_0(%arg0: i32) -> (i32, i32, i32) {
    %c0_i32 = arith.constant 0 : i32
    %c0_i32_0 = arith.constant 0 : i32
    %c0_i32_1 = arith.constant 0 : i32
    return %arg0, %c0_i32, %c0_i32_0 : i32, i32, i32
  }
  func.func @transform_1(%arg0: i32) -> (i32, i32, i32) {
    %c0_i32 = arith.constant 0 : i32
    %c0_i32_0 = arith.constant 0 : i32
    %c0_i32_1 = arith.constant 0 : i32
    return %arg0, %c0_i32, %c0_i32_0 : i32, i32, i32
  }
  func.func @transform_2(%arg0: i32) -> (i32, i32, i32) {
    %c0_i32 = arith.constant 0 : i32
    %c0_i32_0 = arith.constant 0 : i32
    %c0_i32_1 = arith.constant 0 : i32
    %c0_i32_2 = arith.constant 0 : i32
    return %c0_i32, %c0_i32_0, %c0_i32_1 : i32, i32, i32
  }
  func.func @transform_3(%arg0: i32) -> (i32, i32) {
    %c0_i32 = arith.constant 0 : i32
    %c0_i32_0 = arith.constant 0 : i32
    %c0_i32_1 = arith.constant 0 : i32
    return %c0_i32, %c0_i32_0 : i32, i32
  }
  func.func @transform_4(%arg0: i32) -> (i32, i32, i32) {
    %c0_i32 = arith.constant 0 : i32
    %c0_i32_0 = arith.constant 0 : i32
    %c0_i32_1 = arith.constant 0 : i32
    %c0_i32_2 = arith.constant 0 : i32
    return %c0_i32, %c0_i32_0, %c0_i32_1 : i32, i32, i32
  }
  func.func @transform_5(%arg0: i32) -> (i32, i32, i32) {
    %c0_i32 = arith.constant 0 : i32
    %c0_i32_0 = arith.constant 0 : i32
    %c0_i32_1 = arith.constant 0 : i32
    return %arg0, %c0_i32, %c0_i32_0 : i32, i32, i32
  }
}

</mosaic_0001>

<bundles_post_ra>
// kernel: tpu_custom_call.1
= control target key start
LH: loop header
LB: loop body
LE: loop exit
PB: predicated region body
PF: predicated region fallthrough
CT: control target
= control target key end

     0   :  { %10 = vsyncpa [#allocation3], 0  ;;  %s2525_s0 = inlined_call_operand.vmem [shape: f32[2,4,256], index: 0, kind: input, shape index: {}]   ;;  %s2526_s1 = inlined_call_operand.hbm [shape: f32[2,4,256], index: 1, kind: input, shape index: {}]   ;;  %s2527_s2 = inlined_call_operand.vmem [shape: f32[18,4,4], index: 2, kind: input, shape index: {}]   ;;  %s2528_s3 = inlined_call_operand.vmem [shape: f32[4,1], index: 3, kind: input, shape index: {}]   ;;  %s2529_s4 = inlined_call_operand.vmem [shape: f32[9,4,256], index: 4, kind: input, shape index: {}]   ;;  %s2530_s5 = inlined_call_operand.hbm [shape: f32[2,4,256], index: 5, kind: output, shape index: {}]  }
   0x1   :  { %12 = vsyncpa [#allocation3 + $0x1], 0 }
   0x2   :  { %13 = vsyncpa [#allocation4], 0 }
   0x3   :  { %15 = vsyncpa [#allocation4 + $0x1], 0  ;;  %s1967_s18 = smov 0   ;;  %s1969_s19 = smov 0  }
   0x4   :  { %s1971_s20 = smov 0   ;;  %s1973_s21 = smov 0  }
   0x5 LB: > { %s1988_s22 = sadd.s32 4294967295, %s1926_s21   ;;  %s1658_s23 = sadd.s32 4294967294, %s1926_s21   ;;  %s1926_s21 = sphi %s1973_s21, %s2540_s21   ;;  %s1922_s20 = sphi %s1971_s20, %s2539_s20   ;;  %s1918_s19 = sphi %s1969_s19, %s2538_s19   ;;  %s1914_s18 = sphi %s1967_s18, %s2537_s18  }
   0x6   : > { %s1992_s24 = sadd.s32 1, %s1926_s21   ;;  %s54_s25 = sadd.s32 1, %s1922_s20 }
   0x7   : > { %s51_s26 = ssub.s32 %s1926_s21, %s1992_s24  ;;  %p61_p0 = scmp.ne.s32.totalorder %s1922_s20, %s1918_s19 }
   0x8   : > { %p52_p1 = scmp.eq.s32.totalorder %s51_s26, 0  ;;  %p62_p2 = scmp.eq.s32.totalorder %s1926_s21, 0 }
   0x9   : > { %p67_p3 = scmp.ne.s32.totalorder %s1918_s19, %s1914_s18  ;;  %p68_p4 = scmp.eq.s32.totalorder %s1988_s22, 0 }
   0xa   : > { %s2004_s27 = scalar_select %p52_p1, %s1922_s20, %s54_s25  }
   0xb   : > { %p2006_p5 = por %p62_p2, %p61_p0  ;;  %p2010_p6 = por %p68_p4, %p67_p3 }
   0xc   : > { %p154_p7 = scmp.eq.s32.totalorder %s1988_s22, 1  ;;  %p160_p8 = scmp.eq.s32.totalorder %s1658_s23, 1 }
   0xd   : > { %p1785_p10 = scmp.lt.s32.totalorder %s1926_s21, 2  ;;  %s197_s7 = sand.u32 1, %s1922_s20  }
   0xe   : > { %p2017_p11 = por %p154_p7, %p61_p0  ;;  %p2021_p12 = por %p160_p8, %p67_p3 }
   0xf   : > { %s1770_s8 = sshll.u32 %s1926_s21, 3  ;;  %s1661_s9 = sshll.u32 %s197_s7, 3 }
  0x10   : > { %s206_s12 = scalar_lea.hbm %s2526_s1, %s1770_s8  ;;  %s201_s14 = scalar_lea.vmem [#allocation2], %s1661_s9 }
  0x11   : > { %s208_s13 = sshll.u32 %s206_s12, 4  ;;  %s210_s15 = sshll.u32 %s201_s14, 4  ;;  %s209_s13 = int_to_ptr.hbm [resolvable:$true] %s208_s13  ;;  %s211_s15 = int_to_ptr.vmem [resolvable:$true] %s210_s15 }
  0x12   : > { %p2032_p13 = pnand %p1785_p10, %p2006_p5  ;;  %p1664_p0 = scmp.ge.s32.totalorder %s1926_s21, 1 }
  0x13   : > { %p215_p1 = scmp.lt.s32.totalorder %s1926_s21, 3  ;;  %s198_s17 = scalar_lea.sflag [#allocation3], %s197_s7 }
  0x14   : > { %s1830_s23 = sshra.s32 %s209_s13, 4  ;;  %p1834_p3 = pneg %p2032_p13  ;;  %s1831_s23 = int_to_ptr.hbm [resolvable:$true] %s1830_s23 }
  0x15   : > { %s1832_s25 = scalar_lea.hbm %s1831_s23, 8  ;;  %s1837_s28 = scalar_lea.hbm %s2526_s1, 16 }
  0x16   : > { %p1833_p2 = scmp.ne.s32.totalorder %s1831_s23, %s1832_s25  ;;  %p1838_p5 = scmp.lt.s32.totalorder %s1831_s23, %s2526_s1 }
  0x17   : > { %p1839_p8 = scmp.lt.s32.totalorder %s1837_s28, %s1832_s25 }
  0x18   : > { %p1835_p4 = pnand %p1834_p3, %p1833_p2 }
  0x19   : > { %p1840_p10 = por %p1839_p8, %p1838_p5 }
  0x1a   : > { %p1836_p7 = pneg %p1835_p4 }
  0x1c   : > { %p1841_p9 = pnand %p1840_p10, %p1836_p7 }
  0x1e   : > { %1844 = shalt.err (!%p1841_p9)
}
  0x1f   : > { %1780 = dma.hbm_to_vmem [thread:$0]  (!%p2032_p13), %s209_s13, 128, %s211_s15, %s198_s17  }
  0x20   : > { %p216_p2 = pnand %p1664_p0, %p215_p1 }
  0x21   : > { %s2053_s7 = sand.u32 (!%p216_p2), 1, %s1918_s19  }
  0x22   : > { %219 = sbr.rel (%p216_p2) target bundleno = 576 (0x240), region = 40  ;;  %s1665_s11 = sshll.u32 (!%p216_p2), %s2053_s7, 3 }
  0x23   : > { %s222_s12 = scalar_lea.sflag (!%p216_p2), [#allocation3], %s2053_s7  ;;  %s2059_s14 = scalar_lea.vmem (!%p216_p2), [#allocation2], %s1665_s11 }
  0x27   : > { %1905 = dma.done.wait (%p2010_p6), %s222_s12, 128  }
  0x28   : > { %1907 = vsyncadd (%p2010_p6), %s222_s12, 4294967168  ;;  %p258_p9 = scmp.lt.s32.totalorder %s1988_s22, 1  ;;  %v2076_v1 = vld [vmem:[%s2529_s4] sm:$0xff]  ;;  %s1928_s29 = smov 17   ;;  %v2089_v6 = vld [vmem:[%s2529_s4 + $0x8] sm:$0xff]  ;;  %vm299_vm3 = vcmask 1043456  }
  0x29   : > { %s1929_s9 = smov 16   ;;  %v2102_v11 = vld [vmem:[%s2529_s4 + $0x10] sm:$0xff]  ;;  %v2115_v16 = vld [vmem:[%s2529_s4 + $0x18] sm:$0xff]  ;;  %s1931_s17 = smov 1   ;;  %v2133_v23 = vld [vmem:[%s2529_s4 + $0x28] sm:$0xff]  ;;  %vm295_vm4 = vcmask 31744  }
  0x2a   : > { %s259_s13 = scalar_select %p258_p9, %s1988_s22, 1  ;;  %v2146_v28 = vld [vmem:[%s2529_s4 + $0x30] sm:$0xff]  ;;  %v2159_v33 = vld [vmem:[%s2529_s4 + $0x38] sm:$0xff]  ;;  %v2172_v38 = vld [vmem:[%s2529_s4 + $0x40] sm:$0xff] }
  0x2b   : > { %s1932_s26 = smov 127   ;;  %s1933_s10 = smov 113   ;;  %v2178_v41 = vld [vmem:[%s2059_s14] sm:$0xff] }
  0x2c   : > { %s1771_s15 = sshll.u32 %s259_s13, 3  ;;  %s1930_s13 = smov 15  }
  0x2d   : > { %s262_s23 = scalar_lea.vmem %s2525_s0, %s1771_s15  ;;  %s1934_s16 = smov 112  }
  0x2e   : > { %v2070_v0 = vld [vmem:[%s262_s23] sm:$0xff]  ;;  %s1935_s8 = smov 111   ;;  %s1772_s23 = sshll.u32 %s1988_s22, 3 }
  0x2f   : > { %271 = vst [vmem:[#allocation1] ss:$2 sm:$0xff] %v2070_v0  ;;  %s257_s14 = scalar_lea.vmem [#allocation5], %s1665_s11  ;;  %s1560_s22 = scalar_lea.sflag [#allocation4], %s2053_s7 }
  0x30   : > { %s1880_s11 = scalar_lea.hbm %s2530_s5, 16 }
  0x36   : > { %v272_v2 = vld.sshfl [vmem:[#allocation1] sm:$0xff pattern:$0x75316420]  ;;  %v273_v3 = vld.sshfl [vmem:[#allocation1 + $0x8] sm:$0xff pattern:$0x75316420] }
  0x37   : > { %287 = vst [vmem:[#allocation1] ss:$2 sm:$0xff] %v2076_v1  ;;  %276 = vrot.lane.b32.xlu1 %v272_v2, %s1928_s29 }
  0x3e   : > { %v2080_v4 = vld.sshfl [vmem:[#allocation1] sm:$0xff pattern:$0x75316420]  ;;  %v2082_v5 = vld.sshfl [vmem:[#allocation1 + $0x8] sm:$0xff pattern:$0x75316420] }
  0x3f   : > { %348 = vst [vmem:[#allocation1] ss:$2 sm:$0xff] %v2070_v0  ;;  %278 = vrot.lane.b32.xlu1 %v273_v3, %s1928_s29 }
  0x46   : > { %v349_v7 = vld.sshfl [vmem:[#allocation1] sm:$0xff pattern:$0x75316420]  ;;  %v350_v8 = vld.sshfl [vmem:[#allocation1 + $0x8] sm:$0xff pattern:$0x75316420] }
  0x47   : > { %353 = vrot.lane.b32.xlu0 %v349_v7, %s1929_s9  ;;  %363 = vst [vmem:[#allocation1] ss:$2 sm:$0xff] %v2089_v6 }
  0x4e   : > { %v2093_v9 = vld.sshfl [vmem:[#allocation1] sm:$0xff pattern:$0x75316420]  ;;  %v2095_v10 = vld.sshfl [vmem:[#allocation1 + $0x8] sm:$0xff pattern:$0x75316420] }
  0x4f   : > { %355 = vrot.lane.b32.xlu0 %v350_v8, %s1929_s9  ;;  %423 = vst [vmem:[#allocation1] ss:$2 sm:$0xff] %v2070_v0 }
  0x56   : > { %v424_v12 = vld.sshfl [vmem:[#allocation1] sm:$0xff pattern:$0x75316420]  ;;  %v425_v13 = vld.sshfl [vmem:[#allocation1 + $0x8] sm:$0xff pattern:$0x75316420] }
  0x57   : > { %428 = vrot.lane.b32.xlu0 %v424_v12, %s1930_s13  ;;  %438 = vst [vmem:[#allocation1] ss:$2 sm:$0xff] %v2102_v11  ;;  %430 = vrot.lane.b32.xlu1 %v425_v13, %s1930_s13  ;;  %v280_v12 = vlaneseq }
  0x5e   : > { %v2107_v14 = vld.sshfl [vmem:[#allocation1] sm:$0xff pattern:$0x75316420]  ;;  %v2109_v15 = vld.sshfl [vmem:[#allocation1 + $0x8] sm:$0xff pattern:$0x75316420] }
  0x5f   : > { %498 = vst [vmem:[#allocation1] ss:$2 sm:$0xff] %v2070_v0 }
  0x66   : > { %v499_v17 = vld.sshfl [vmem:[#allocation1] sm:$0xff pattern:$0x75316420]  ;;  %v500_v18 = vld.sshfl [vmem:[#allocation1 + $0x8] sm:$0xff pattern:$0x75316420] }
  0x67   : > { %513 = vst [vmem:[#allocation1] ss:$2 sm:$0xff] %v2115_v16  ;;  %503 = vrot.lane.b32.xlu2 %v499_v17, %s1931_s17 }
  0x6e   : > { %v2119_v19 = vld.sshfl [vmem:[#allocation1] sm:$0xff pattern:$0x75316420]  ;;  %v2121_v20 = vld.sshfl [vmem:[#allocation1 + $0x8] sm:$0xff pattern:$0x75316420] }
  0x6f   : > { %575 = vst [vmem:[#allocation1] ss:$2 sm:$0xff] %v2070_v0  ;;  %505 = vrot.lane.b32.xlu2 %v500_v18, %s1931_s17 }
  0x76   : > { %v2125_v21 = vld.sshfl [vmem:[#allocation1] sm:$0xff pattern:$0x75316420]  ;;  %v2127_v22 = vld.sshfl [vmem:[#allocation1 + $0x8] sm:$0xff pattern:$0x75316420] }
  0x77   : > { %627 = vst [vmem:[#allocation1] ss:$2 sm:$0xff] %v2070_v0 }
  0x7e   : > { %v629_v24 = vld.sshfl [vmem:[#allocation1 + $0x8] sm:$0xff pattern:$0x75316420]  ;;  %v628_v25 = vld.sshfl [vmem:[#allocation1] sm:$0xff pattern:$0x75316420] }
  0x7f   : > { %634 = vrot.lane.b32.xlu0 %v629_v24, %s1932_s26  ;;  %642 = vst [vmem:[#allocation1] ss:$2 sm:$0xff] %v2133_v23  ;;  %632 = vrot.lane.b32.xlu2 %v628_v25, %s1932_s26 }
  0x86   : > { %v2138_v26 = vld.sshfl [vmem:[#allocation1] sm:$0xff pattern:$0x75316420]  ;;  %v2140_v27 = vld.sshfl [vmem:[#allocation1 + $0x8] sm:$0xff pattern:$0x75316420] }
  0x87   : > { %702 = vst [vmem:[#allocation1] ss:$2 sm:$0xff] %v2070_v0 }
  0x8e   : > { %v704_v29 = vld.sshfl [vmem:[#allocation1 + $0x8] sm:$0xff pattern:$0x75316420]  ;;  %v703_v30 = vld.sshfl [vmem:[#allocation1] sm:$0xff pattern:$0x75316420] }
  0x8f   : > { %709 = vrot.lane.b32.xlu1 %v704_v29, %s1933_s10  ;;  %707 = vrot.lane.b32.xlu0 %v703_v30, %s1933_s10  ;;  %717 = vst [vmem:[#allocation1] ss:$2 sm:$0xff] %v2146_v28 }
  0x96   : > { %v2151_v31 = vld.sshfl [vmem:[#allocation1] sm:$0xff pattern:$0x75316420]  ;;  %v2153_v32 = vld.sshfl [vmem:[#allocation1 + $0x8] sm:$0xff pattern:$0x75316420] }
  0x97   : > { %777 = vst [vmem:[#allocation1] ss:$2 sm:$0xff] %v2070_v0 }
  0x9e   : > { %v779_v34 = vld.sshfl [vmem:[#allocation1 + $0x8] sm:$0xff pattern:$0x75316420]  ;;  %v778_v35 = vld.sshfl [vmem:[#allocation1] sm:$0xff pattern:$0x75316420] }
  0x9f   : > { %782 = vrot.lane.b32.xlu1 %v778_v35, %s1934_s16  ;;  %792 = vst [vmem:[#allocation1] ss:$2 sm:$0xff] %v2159_v33  ;;  %784 = vrot.lane.b32.xlu2 %v779_v34, %s1934_s16 }
  0xa6   : > { %v2164_v36 = vld.sshfl [vmem:[#allocation1] sm:$0xff pattern:$0x75316420]  ;;  %v2166_v37 = vld.sshfl [vmem:[#allocation1 + $0x8] sm:$0xff pattern:$0x75316420] }
  0xa7   : > { %852 = vst [vmem:[#allocation1] ss:$2 sm:$0xff] %v2070_v0 }
  0xae   : > { %v853_v39 = vld.sshfl [vmem:[#allocation1] sm:$0xff pattern:$0x75316420]  ;;  %v854_v40 = vld.sshfl [vmem:[#allocation1 + $0x8] sm:$0xff pattern:$0x75316420] }
  0xaf   : > { %867 = vst [vmem:[#allocation1] ss:$2 sm:$0xff] %v2172_v38  ;;  %857 = vrot.lane.b32.xlu1 %v853_v39, %s1935_s8  ;;  %859 = vrot.lane.b32.xlu2 %v854_v40, %s1935_s8  ;;  %v1674_v40 = vld [vmem:[%s2527_s2 + $0x4] sm:$0xf] }
  0xb6   : > { %v2180_v42 = vld.sshfl [vmem:[#allocation1] sm:$0xff pattern:$0x75316420]  ;;  %v2182_v43 = vld.sshfl [vmem:[#allocation1 + $0x8] sm:$0xff pattern:$0x75316420] }
  0xb7   : > { %929 = vst [vmem:[#allocation1] ss:$2 sm:$0xff] %v2178_v41 }
  0xb9   : > { %v354_v8 = vpop.permute.xlu0 %353 }
  0xbe   : > { %v931_v44 = vld.sshfl [vmem:[#allocation1 + $0x8] sm:$0xff pattern:$0x75316420]  ;;  %v930_v45 = vld.sshfl [vmem:[#allocation1] sm:$0xff pattern:$0x75316420] }
  0xbf   : > { %936 = vrot.lane.b32.xlu0 %v931_v44, %s1928_s29  ;;  %940 = vst [vmem:[#allocation1] ss:$2 sm:$0xff] %v2076_v1  ;;  %934 = vrot.lane.b32.xlu2 %v930_v45, %s1928_s29  ;;  %s1573_s29 = sshll.u32 %s257_s14, 4  ;;  %s1574_s29 = int_to_ptr.vmem [resolvable:$true] %s1573_s29 }
  0xc1   : > { %v504_v13 = vpop.permute.xlu2 %503 }
  0xc6   : > { %v2188_v46 = vld.sshfl [vmem:[#allocation1] sm:$0xff pattern:$0x75316420]  ;;  %v2190_v47 = vld.sshfl [vmem:[#allocation1 + $0x8] sm:$0xff pattern:$0x75316420] }
  0xc7   : > { %1000 = vst [vmem:[#allocation1] ss:$2 sm:$0xff] %v2178_v41 }
  0xc9   : > { %v506_v34 = vpop.permute.xlu2 %505 }
  0xce   : > { %v1001_v48 = vld.sshfl [vmem:[#allocation1] sm:$0xff pattern:$0x75316420]  ;;  %v1002_v49 = vld.sshfl [vmem:[#allocation1 + $0x8] sm:$0xff pattern:$0x75316420] }
  0xcf   : > { %1011 = vst [vmem:[#allocation1] ss:$2 sm:$0xff] %v2089_v6  ;;  %1005 = vrot.lane.b32.xlu2 %v1001_v48, %s1929_s9 }
  0xd6   : > { %v2195_v50 = vld.sshfl [vmem:[#allocation1] sm:$0xff pattern:$0x75316420]  ;;  %v2197_v51 = vld.sshfl [vmem:[#allocation1 + $0x8] sm:$0xff pattern:$0x75316420] }
  0xd7   : > { %1071 = vst [vmem:[#allocation1] ss:$2 sm:$0xff] %v2178_v41 }
  0xde   : > { %v1072_v52 = vld.sshfl [vmem:[#allocation1] sm:$0xff pattern:$0x75316420]  ;;  %v1073_v53 = vld.sshfl [vmem:[#allocation1 + $0x8] sm:$0xff pattern:$0x75316420] }
  0xdf   : > { %1076 = vrot.lane.b32.xlu0 %v1072_v52, %s1930_s13  ;;  %1078 = vrot.lane.b32.xlu1 %v1073_v53, %s1930_s13  ;;  %1082 = vst [vmem:[#allocation1] ss:$2 sm:$0xff] %v2102_v11  ;;  %v277_v11 = vpop.permute.xlu1 %276 }
  0xe6   : > { %v2203_v54 = vld.sshfl [vmem:[#allocation1] sm:$0xff pattern:$0x75316420]  ;;  %v2205_v55 = vld.sshfl [vmem:[#allocation1 + $0x8] sm:$0xff pattern:$0x75316420] }
  0xe7   : > { %1007 = vrot.lane.b32.xlu0 %v1002_v49, %s1929_s9  ;;  %1142 = vst [vmem:[#allocation1] ss:$2 sm:$0xff] %v2178_v41  ;;  %v279_v24 = vpop.permute.xlu1 %278 }
  0xee   : > { %v1143_v56 = vld.sshfl [vmem:[#allocation1] sm:$0xff pattern:$0x75316420]  ;;  %v1144_v57 = vld.sshfl [vmem:[#allocation1 + $0x8] sm:$0xff pattern:$0x75316420] }
  0xef   : > { %1147 = vrot.lane.b32.xlu1 %v1143_v56, %s1931_s17  ;;  %1153 = vst [vmem:[#allocation1] ss:$2 sm:$0xff] %v2115_v16  ;;  %1149 = vrot.lane.b32.xlu2 %v1144_v57, %s1931_s17  ;;  %v2238_v16 = vand.u32 127, %v280_v12  ;;  %v633_v56 = vpop.permute.xlu2 %632 }
  0xf1   : > { %vm357_vm0 = vcmp.lt.s32.totalorder %v2238_v16, 16  ;;  %vm282_vm1 = vcmp.lt.s32.totalorder %v2238_v16, 17  ;;  %vm507_vm2 = vcmp.lt.s32.totalorder %v2238_v16, 1  ;;  %vm432_vm5 = vcmp.lt.s32.totalorder %v2238_v16, 15 }
  0xf2   : > { %v283_v29 = vsel %vm282_vm1, %v277_v11, %v279_v24  ;;  %v284_v30 = vsel %vm282_vm1, %v279_v24, %v277_v11  ;;  %v509_v35 = vsel %vm507_vm2, %v506_v34, %v504_v13  ;;  %vm636_vm6 = vcmp.lt.s32.totalorder %v2238_v16, 127 }
  0xf3   : > { %v293_v45 = vmul.f32 %v2082_v5, %v283_v29  ;;  %v292_v48 = vmul.f32 %v2080_v4, %v284_v30  ;;  %v518_v49 = vmul.f32 %v2119_v19, %v509_v35  ;;  %v431_v19 = vpop.permute.xlu1 %430  ;;  %vm711_vm7 = vcmp.lt.s32.totalorder %v2238_v16, 113  ;;  %v1703_v35 = vld [vmem:[%s2527_s2 + $0x18] sm:$0xf] }
  0xf4   : > { %vm786_vm8 = vcmp.lt.s32.totalorder %v2238_v16, 112  ;;  %vm861_vm9 = vcmp.lt.s32.totalorder %v2238_v16, 111 }
  0xf5   : > { %1671 = vmatpush.msk.msra.mxu1 %vm299_vm3, %v293_v45  ;;  %1669 = vmatpush.msk.msra.mxu0 %vm299_vm3, %v292_v48 }
  0xf6   : > { %v2212_v58 = vld.sshfl [vmem:[#allocation1] sm:$0xff pattern:$0x75316420]  ;;  %v2214_v59 = vld.sshfl [vmem:[#allocation1 + $0x8] sm:$0xff pattern:$0x75316420] }
  0xf7   : > { %1215 = vst [vmem:[#allocation1] ss:$2 sm:$0xff] %v2178_v41 }
  0xfe   : > { %v2217_v60 = vld.sshfl [vmem:[#allocation1] sm:$0xff pattern:$0x75316420]  ;;  %v2219_v61 = vld.sshfl [vmem:[#allocation1 + $0x8] sm:$0xff pattern:$0x75316420] }
  0xff   : > { %1267 = vst [vmem:[#allocation1] ss:$2 sm:$0xff] %v2178_v41 }
 0x106   : > { %v1268_v62 = vld.sshfl [vmem:[#allocation1] sm:$0xff pattern:$0x75316420]  ;;  %v1269_v63 = vld.sshfl [vmem:[#allocation1 + $0x8] sm:$0xff pattern:$0x75316420] }
 0x107   : > { %1278 = vst [vmem:[#allocation1] ss:$2 sm:$0xff] %v2133_v23  ;;  %1272 = vrot.lane.b32.xlu2 %v1268_v62, %s1932_s26  ;;  %v356_v23 = vpop.permute.xlu0 %355 }
 0x108   : > { %v358_v25 = vsel %vm357_vm0, %v354_v8, %v356_v23 }
 0x109   : > { %v369_v39 = vmul.f32 %v2095_v10, %v358_v25  ;;  %v294_v10 = vld [vmem:[%s2527_s2] sm:$0xf] }
 0x10a   : > { %1672 = vmatmul.msk.f32.vlgmr.msra.gmra.mxu1 %vm295_vm4, %v294_v10  ;;  %1670 = vmatmul.msk.f32.vlgmr.msra.gmra.mxu0 %vm295_vm4, %v294_v10  ;;  %v1720_v10 = vld [vmem:[%s2527_s2 + $0x24] sm:$0xf] }
 0x10b   : > { %1677 = vmatpush.msk.msra.mxu3 %vm299_vm3, %v369_v39 }
 0x10c   : > { %1678 = vmatmul.msk.f32.vlgmr.msra.gmra.mxu3 %vm295_vm4, %v1674_v40 }
 0x10e   : > { %v2224_v0 = vld.sshfl [vmem:[#allocation1] sm:$0xff pattern:$0x75316420]  ;;  %v2226_v1 = vld.sshfl [vmem:[#allocation1 + $0x8] sm:$0xff pattern:$0x75316420] }
 0x10f   : > { %1338 = vst [vmem:[#allocation1] ss:$2 sm:$0xff] %v2178_v41 }
 0x116   : > { %v1339_v2 = vld.sshfl [vmem:[#allocation1] sm:$0xff pattern:$0x75316420]  ;;  %v1340_v3 = vld.sshfl [vmem:[#allocation1 + $0x8] sm:$0xff pattern:$0x75316420] }
 0x117   : > { %1343 = vrot.lane.b32.xlu0 %v1339_v2, %s1933_s10  ;;  %1345 = vrot.lane.b32.xlu1 %v1340_v3, %s1933_s10  ;;  %1349 = vst [vmem:[#allocation1] ss:$2 sm:$0xff] %v2146_v28  ;;  %v359_v28 = vsel %vm357_vm0, %v356_v23, %v354_v8  ;;  %v710_v3 = vpop.permute.xlu1 %709  ;;  %v785_v8 = vpop.permute.xlu2 %784 }
 0x118   : > { %v368_v44 = vmul.f32 %v2093_v9, %v359_v28  ;;  %v429_v9 = vpop.permute.xlu0 %428 }
 0x119   : > { %v434_v53 = vsel %vm432_vm5, %v431_v19, %v429_v9 }
 0x11a   : > { %1675 = vmatpush.msk.msra.mxu2 %vm299_vm3, %v368_v44  ;;  %v443_v57 = vmul.f32 %v2107_v14, %v434_v53  ;;  %v1730_v53 = vld [vmem:[%s2527_s2 + $0x2c] sm:$0xf] }
 0x11b   : > { %1676 = vmatmul.msk.f32.vlgmr.msra.gmra.mxu2 %vm295_vm4, %v1674_v40 }
 0x11c   : > { %1687 = vmatpush.msk.msrb.mxu2 %vm299_vm3, %v518_v49  ;;  %1681 = vmatpush.msk.msrb.mxu0 %vm299_vm3, %v443_v57 }
 0x11e   : > { %v2232_v6 = vld.sshfl [vmem:[#allocation1] sm:$0xff pattern:$0x75316420]  ;;  %v2234_v7 = vld.sshfl [vmem:[#allocation1 + $0x8] sm:$0xff pattern:$0x75316420]  ;;  %1692 = vmatpush.msk.msra.mxu0 %vm299_vm3, %v2125_v21 }
 0x11f   : > { %1409 = vst [vmem:[#allocation1] ss:$2 sm:$0xff] %v2178_v41  ;;  %1274 = vrot.lane.b32.xlu0 %v1269_v63, %s1932_s26  ;;  %v1680_v63 = vld [vmem:[%s2527_s2 + $0x8] sm:$0xf]  ;;  %v860_v28 = vpop.permute.xlu2 %859 }
 0x120   : > { %1682 = vmatmul.msk.f32.vlgmr.msrb.gmra.mxu0 %vm295_vm4, %v1680_v63  ;;  %v635_v2 = vpop.permute.xlu0 %634 }
 0x121   : > { %v638_v21 = vsel %vm636_vm6, %v635_v2, %v633_v56 }
 0x122   : > { %v648_v12 = vmul.f32 %v2140_v27, %v638_v21  ;;  %v783_v27 = vpop.permute.xlu1 %782 }
 0x123   : > { %v787_v24 = vsel %vm786_vm8, %v783_v27, %v785_v8  ;;  %v788_v25 = vsel %vm786_vm8, %v785_v8, %v783_v27 }
 0x126   : > { %v1410_v17 = vld.sshfl [vmem:[#allocation1] sm:$0xff pattern:$0x75316420]  ;;  %v2243_v18 = vld.sshfl [vmem:[#allocation1 + $0x8] sm:$0xff pattern:$0x75316420] }
 0x127   : > { %1420 = vst [vmem:[#allocation1] ss:$2 sm:$0xff] %v2159_v33  ;;  %1414 = vrot.lane.b32.xlu0 %v1410_v17, %s1934_s16  ;;  %v508_v33 = vsel %vm507_vm2, %v504_v13, %v506_v34  ;;  %v1697_v13 = vld [vmem:[%s2527_s2 + $0x14] sm:$0xf]  ;;  %v798_v34 = vmul.f32 %v2166_v37, %v788_v25  ;;  %v935_v39 = vpop.permute.xlu2 %934 }
 0x128   : > { %v519_v52 = vmul.f32 %v2121_v20, %v508_v33  ;;  %v433_v20 = vsel %vm432_vm5, %v429_v9, %v431_v19  ;;  %v1709_v33 = vld [vmem:[%s2527_s2 + $0x1c] sm:$0xf] }
 0x129   : > { %v444_v62 = vmul.f32 %v2109_v15, %v433_v20 }
 0x12a   : > { %1689 = vmatpush.msk.msrb.mxu3 %vm299_vm3, %v519_v52 }
 0x12b   : > { %1683 = vmatpush.msk.msrb.mxu1 %vm299_vm3, %v444_v62 }
 0x12c   : > { %1684 = vmatmul.msk.f32.vlgmr.msrb.gmra.mxu1 %vm295_vm4, %v1680_v63  ;;  %1700 = vmatpush.msk.msra.mxu3 %vm299_vm3, %v648_v12  ;;  %v1725_v63 = vld [vmem:[%s2527_s2 + $0x28] sm:$0xf] }
 0x12d   : > { %1694 = vmatpush.msk.msra.mxu1 %vm299_vm3, %v2127_v22  ;;  %v637_v22 = vsel %vm636_vm6, %v633_v56, %v635_v2  ;;  %v1740_v2 = vld [vmem:[%s2527_s2 + $0x34] sm:$0xf] }
 0x12e   : > { %v2278_v4 = vld.sshfl [vmem:[#allocation1] sm:$0xff pattern:$0x75316420]  ;;  %v2280_v5 = vld.sshfl [vmem:[#allocation1 + $0x8] sm:$0xff pattern:$0x75316420]  ;;  %v647_v11 = vmul.f32 %v2138_v26, %v637_v22  ;;  %v708_v26 = vpop.permute.xlu0 %707 }
 0x12f   : > { %1480 = vst [vmem:[#allocation1] ss:$2 sm:$0xff] %v2178_v41  ;;  %v1686_v41 = vld [vmem:[%s2527_s2 + $0xc] sm:$0xf]  ;;  %v712_v17 = vsel %vm711_vm7, %v708_v26, %v710_v3  ;;  %v713_v23 = vsel %vm711_vm7, %v710_v3, %v708_v26  ;;  %v1006_v56 = vpop.permute.xlu2 %1005  ;;  %v1735_v3 = vld [vmem:[%s2527_s2 + $0x30] sm:$0xf] }
 0x130   : > { %1690 = vmatmul.msk.f32.vlgmr.msrb.gmra.mxu3 %vm295_vm4, %v1686_v41  ;;  %1688 = vmatmul.msk.f32.vlgmr.msrb.gmra.mxu2 %vm295_vm4, %v1686_v41  ;;  %v722_v29 = vmul.f32 %v2151_v31, %v712_v17  ;;  %v723_v30 = vmul.f32 %v2153_v32, %v713_v23  ;;  %v858_v32 = vpop.permute.xlu1 %857 }
 0x131   : > { %1698 = vmatpush.msk.msra.mxu2 %vm299_vm3, %v647_v11  ;;  %1712 = vmatpush.msk.msrb.mxu3 %vm299_vm3, %v798_v34  ;;  %v863_v37 = vsel %vm861_vm9, %v860_v28, %v858_v32 }
 0x132   : > { %1706 = vmatpush.msk.msrb.mxu1 %vm299_vm3, %v723_v30  ;;  %1704 = vmatpush.msk.msrb.mxu0 %vm299_vm3, %v722_v29  ;;  %v873_v44 = vmul.f32 %v2182_v43, %v863_v37 }
 0x136   : > { %v1481_v14 = vld.sshfl [vmem:[#allocation1] sm:$0xff pattern:$0x75316420]  ;;  %v1482_v15 = vld.sshfl [vmem:[#allocation1 + $0x8] sm:$0xff pattern:$0x75316420]  ;;  %v937_v31 = vpop.permute.xlu0 %936 }
 0x137   : > { %1485 = vrot.lane.b32.xlu1 %v1481_v14, %s1935_s8  ;;  %1487 = vrot.lane.b32.xlu2 %v1482_v15, %s1935_s8  ;;  %1491 = vst [vmem:[#allocation1] ss:$2 sm:$0xff] %v2172_v38  ;;  %v1691_v38 = vld [vmem:[%s2527_s2 + $0x10] sm:$0xf]  ;;  %v938_v45 = vsel %vm282_vm1, %v935_v39, %v937_v31  ;;  %v939_v48 = vsel %vm282_vm1, %v937_v31, %v935_v39  ;;  %s1571_s8 = scalar_lea.hbm %s2530_s5, %s1772_s23 }
 0x138   : > { %1701 = vmatmul.msk.f32.vlgmr.msra.gmra.mxu3 %vm295_vm4, %v1697_v13  ;;  %1699 = vmatmul.msk.f32.vlgmr.msra.gmra.mxu2 %vm295_vm4, %v1697_v13  ;;  %v945_v49 = vmul.f32 %v2188_v46, %v939_v48  ;;  %v946_v52 = vmul.f32 %v2190_v47, %v938_v45  ;;  %s1575_s9 = sshll.u32 %s1571_s8, 4  ;;  %s1576_s9 = int_to_ptr.hbm [resolvable:$true] %s1575_s9 }
 0x139   : > { %1695 = vmatmul.msk.f32.vlgmr.msra.gmra.mxu1 %vm295_vm4, %v1691_v38  ;;  %1693 = vmatmul.msk.f32.vlgmr.msra.gmra.mxu0 %vm295_vm4, %v1691_v38  ;;  %v1750_v38 = vld [vmem:[%s2527_s2 + $0x3c] sm:$0xf]  ;;  %s1874_s13 = sshra.s32 %s1576_s9, 4  ;;  %s1875_s13 = int_to_ptr.hbm [resolvable:$true] %s1874_s13 }
 0x13a   : > { %1718 = vmatpush.msk.msra.mxu1 %vm299_vm3, %v873_v44  ;;  %1723 = vmatpush.msk.msra.mxu3 %vm299_vm3, %v946_v52  ;;  %s1876_s17 = scalar_lea.hbm %s1875_s13, 8  ;;  %p1881_p1 = scmp.lt.s32.totalorder %s1875_s13, %s2530_s5 }
 0x13b   : > { %p1877_p6 = scmp.ne.s32.totalorder %s1875_s13, %s1876_s17  ;;  %p1882_p3 = scmp.lt.s32.totalorder %s1880_s11, %s1876_s17 }
 0x13d   : > { %p1878_p13 = pnand %p1877_p6, %p2017_p11  ;;  %p1883_p4 = por %p1882_p3, %p1881_p1 }
 0x13e   : > { %v1493_v29 = vld.sshfl [vmem:[#allocation1 + $0x8] sm:$0xff pattern:$0x75316420] }
 0x13f   : > { %1416 = vrot.lane.b32.xlu1 %v2243_v18, %s1934_s16  ;;  %v797_v18 = vmul.f32 %v2164_v36, %v787_v24  ;;  %v862_v36 = vsel %vm861_vm9, %v858_v32, %v860_v28  ;;  %v1745_v24 = vld [vmem:[%s2527_s2 + $0x38] sm:$0xf]  ;;  %v1492_v28 = vld.sshfl [vmem:[#allocation1] sm:$0xff pattern:$0x75316420]  ;;  %p1879_p0 = pneg %p1878_p13 }
 0x140   : > { %1713 = vmatmul.msk.f32.vlgmr.msrb.gmra.mxu3 %vm295_vm4, %v1709_v33  ;;  %v872_v40 = vmul.f32 %v2180_v42, %v862_v36  ;;  %v1715_v42 = vld [vmem:[%s2527_s2 + $0x20] sm:$0xf] }
 0x141   : > { %1710 = vmatpush.msk.msrb.mxu2 %vm299_vm3, %v797_v18  ;;  %1707 = vmatmul.msk.f32.vlgmr.msrb.gmra.mxu1 %vm295_vm4, %v1703_v35  ;;  %p1884_p7 = pnand %p1883_p4, %p1879_p0 }
 0x142   : > { %1711 = vmatmul.msk.f32.vlgmr.msrb.gmra.mxu2 %vm295_vm4, %v1709_v33  ;;  %1705 = vmatmul.msk.f32.vlgmr.msrb.gmra.mxu0 %vm295_vm4, %v1703_v35  ;;  %v1760_v33 = vld [vmem:[%s2527_s2 + $0x44] sm:$0xf] }
 0x143   : > { %1716 = vmatpush.msk.msra.mxu0 %vm299_vm3, %v872_v40  ;;  %1721 = vmatpush.msk.msra.mxu2 %vm299_vm3, %v945_v49  ;;  %v1755_v40 = vld [vmem:[%s2527_s2 + $0x40] sm:$0xf] }
 0x148   : > { %1724 = vmatmul.msk.f32.vlgmr.msra.gmra.mxu3 %vm295_vm4, %v1720_v10 }
 0x149   : > { %1719 = vmatmul.msk.f32.vlgmr.msra.gmra.mxu1 %vm295_vm4, %v1715_v42 }
 0x14a   : > { %1722 = vmatmul.msk.f32.vlgmr.msra.gmra.mxu2 %vm295_vm4, %v1720_v10  ;;  %1717 = vmatmul.msk.f32.vlgmr.msra.gmra.mxu0 %vm295_vm4, %v1715_v42 }
 0x151   : > { %v1077_v43 = vpop.permute.xlu0 %1076  ;;  %v1079_v46 = vpop.permute.xlu1 %1078 }
 0x152   : > { %v1080_v47 = vsel %vm432_vm5, %v1077_v43, %v1079_v46  ;;  %v1081_v9 = vsel %vm432_vm5, %v1079_v46, %v1077_v43 }
 0x153   : > { %v1087_v19 = vmul.f32 %v2203_v54, %v1081_v9  ;;  %v1088_v20 = vmul.f32 %v2205_v55, %v1080_v47 }
 0x155   : > { %1733 = vmatpush.msk.msrb.mxu3 %vm299_vm3, %v1088_v20  ;;  %1731 = vmatpush.msk.msrb.mxu2 %vm299_vm3, %v1087_v19 }
 0x156   : > { %1734 = vmatmul.msk.f32.vlgmr.msrb.gmra.mxu3 %vm295_vm4, %v1730_v53  ;;  %1732 = vmatmul.msk.f32.vlgmr.msrb.gmra.mxu2 %vm295_vm4, %v1730_v53 }
 0x157   : > { %1743 = vmatpush.msk.msra.mxu3 %vm299_vm3, %v2219_v61  ;;  %1741 = vmatpush.msk.msra.mxu2 %vm299_vm3, %v2217_v60  ;;  %v1150_v60 = vpop.permute.xlu2 %1149 }
 0x159   : > { %v1008_v54 = vpop.permute.xlu0 %1007 }
 0x15a   : > { %v1009_v55 = vsel %vm357_vm0, %v1006_v56, %v1008_v54  ;;  %v1010_v57 = vsel %vm357_vm0, %v1008_v54, %v1006_v56 }
 0x15b   : > { %v1016_v62 = vmul.f32 %v2195_v50, %v1010_v57  ;;  %v1017_v41 = vmul.f32 %v2197_v51, %v1009_v55 }
 0x15d   : > { %1728 = vmatpush.msk.msrb.mxu1 %vm299_vm3, %v1017_v41  ;;  %1726 = vmatpush.msk.msrb.mxu0 %vm299_vm3, %v1016_v62 }
 0x15e   : > { %1729 = vmatmul.msk.f32.vlgmr.msrb.gmra.mxu1 %vm295_vm4, %v1725_v63  ;;  %1727 = vmatmul.msk.f32.vlgmr.msrb.gmra.mxu0 %vm295_vm4, %v1725_v63 }
 0x15f   : > { %1744 = vmatmul.msk.f32.vlgmr.msra.gmra.mxu3 %vm295_vm4, %v1740_v2  ;;  %1742 = vmatmul.msk.f32.vlgmr.msra.gmra.mxu2 %vm295_vm4, %v1740_v2 }
 0x161   : > { %v1148_v61 = vpop.permute.xlu1 %1147  ;;  %v1273_v26 = vpop.permute.xlu2 %1272 }
 0x162   : > { %v1151_v14 = vsel %vm507_vm2, %v1148_v61, %v1150_v60  ;;  %v1152_v50 = vsel %vm507_vm2, %v1150_v60, %v1148_v61 }
 0x163   : > { %v1158_v51 = vmul.f32 %v2212_v58, %v1152_v50  ;;  %v1159_v15 = vmul.f32 %v2214_v59, %v1151_v14  ;;  %v263_v58 = vld [vmem:[%s2528_s3] sm:$0xf]  ;;  %v1936_v59 = vmov 0  }
 0x164   : > { %1828 = vset.pattern.permute.xlu2 %v1936_v59  ;;  %1829 = vset.pattern.permute.xlu0 %v1936_v59 }
 0x165   : > { %1738 = vmatpush.msk.msra.mxu1 %vm299_vm3, %v1159_v15  ;;  %1736 = vmatpush.msk.msra.mxu0 %vm299_vm3, %v1158_v51 }
 0x166   : > { %1739 = vmatmul.msk.f32.vlgmr.msra.gmra.mxu1 %vm295_vm4, %v1735_v3  ;;  %1737 = vmatmul.msk.f32.vlgmr.msra.gmra.mxu0 %vm295_vm4, %v1735_v3 }
 0x167   : > { %266 = vperm.xlu2 %1828, %v263_v58  }
 0x187   : > { %v343_v16 = vpop.f32.mrf.mxu1  ;;  %v323_v48 = vpop.f32.mrf.mxu0 }
 0x189   : > { %v1344_v22 = vpop.permute.xlu0 %1343  ;;  %v1346_v21 = vpop.permute.xlu1 %1345 }
 0x18a   : > { %v1347_v8 = vsel %vm711_vm7, %v1344_v22, %v1346_v21  ;;  %v1348_v11 = vsel %vm711_vm7, %v1346_v21, %v1344_v22 }
 0x18b   : > { %v1354_v12 = vmul.f32 %v2232_v6, %v1347_v8  ;;  %v1355_v13 = vmul.f32 %v2234_v7, %v1348_v11 }
 0x18d   : > { %1753 = vmatpush.msk.msrb.mxu3 %vm299_vm3, %v1355_v13  ;;  %1751 = vmatpush.msk.msrb.mxu2 %vm299_vm3, %v1354_v12 }
 0x18e   : > { %1754 = vmatmul.msk.f32.vlgmr.msrb.gmra.mxu3 %vm295_vm4, %v1750_v38  ;;  %1752 = vmatmul.msk.f32.vlgmr.msrb.gmra.mxu2 %vm295_vm4, %v1750_v38 }
 0x18f   : > { %v418_v44 = vpop.f32.mrf.mxu3 }
 0x191   : > { %v1275_v27 = vpop.permute.xlu0 %1274  ;;  %v1488_v25 = vpop.permute.xlu2 %1487 }
 0x192   : > { %v1276_v17 = vsel %vm636_vm6, %v1273_v26, %v1275_v27  ;;  %v1277_v6 = vsel %vm636_vm6, %v1275_v27, %v1273_v26 }
 0x193   : > { %v1283_v7 = vmul.f32 %v2224_v0, %v1276_v17  ;;  %v1284_v23 = vmul.f32 %v2226_v1, %v1277_v6 }
 0x195   : > { %1748 = vmatpush.msk.msrb.mxu1 %vm299_vm3, %v1284_v23  ;;  %1746 = vmatpush.msk.msrb.mxu0 %vm299_vm3, %v1283_v7 }
 0x196   : > { %1749 = vmatmul.msk.f32.vlgmr.msrb.gmra.mxu1 %vm295_vm4, %v1745_v24  ;;  %1747 = vmatmul.msk.f32.vlgmr.msrb.gmra.mxu0 %vm295_vm4, %v1745_v24 }
 0x199   : > { %v1415_v35 = vpop.permute.xlu0 %1414 }
 0x19e   : > { %v398_v45 = vpop.f32.mrf.mxu2 }
 0x1a9   : > { %v1486_v30 = vpop.permute.xlu1 %1485  ;;  %v493_v52 = vpop.f32.mrf.mxu1 }
 0x1aa   : > { %v1489_v0 = vsel %vm861_vm9, %v1486_v30, %v1488_v25  ;;  %v1490_v1 = vsel %vm861_vm9, %v1488_v25, %v1486_v30 }
 0x1ab   : > { %v1496_v18 = vmul.f32 %v1492_v28, %v1489_v0  ;;  %v1497_v34 = vmul.f32 %v1493_v29, %v1490_v1 }
 0x1ad   : > { %1761 = vmatpush.msk.msra.mxu2 %vm299_vm3, %v1496_v18  ;;  %1763 = vmatpush.msk.msra.mxu3 %vm299_vm3, %v1497_v34 }
 0x1ae   : > { %1762 = vmatmul.msk.f32.vlgmr.msra.gmra.mxu2 %vm295_vm4, %v1760_v33  ;;  %1764 = vmatmul.msk.f32.vlgmr.msra.gmra.mxu3 %vm295_vm4, %v1760_v33 }
 0x1b1   : > { %v1417_v31 = vpop.permute.xlu1 %1416 }
 0x1b2   : > { %v1418_v32 = vsel %vm786_vm8, %v1415_v35, %v1417_v31  ;;  %v1419_v36 = vsel %vm786_vm8, %v1417_v31, %v1415_v35 }
 0x1b3   : > { %v1425_v37 = vmul.f32 %v2278_v4, %v1418_v32  ;;  %v1426_v39 = vmul.f32 %v2280_v5, %v1419_v36  ;;  %v568_v49 = vpop.f32.mrf.mxu3  ;;  %v548_v4 = vpop.f32.mrf.mxu2 }
 0x1b4   : > { %v473_v5 = vpop.f32.mrf.mxu0 }
 0x1b5   : > { %1756 = vmatpush.msk.msra.mxu0 %vm299_vm3, %v1425_v37  ;;  %1758 = vmatpush.msk.msra.mxu1 %vm299_vm3, %v1426_v39 }
 0x1b6   : > { %1757 = vmatmul.msk.f32.vlgmr.msra.gmra.mxu0 %vm295_vm4, %v1755_v40  ;;  %1759 = vmatmul.msk.f32.vlgmr.msra.gmra.mxu1 %vm295_vm4, %v1755_v40  ;;  %v622_v9 = vpop.f32.mrf.mxu1 }
 0x1bb   : > { %v697_v42 = vpop.f32.mrf.mxu3  ;;  %v677_v43 = vpop.f32.mrf.mxu2 }
 0x1bc   : > { %v602_v19 = vpop.f32.mrf.mxu0 }
 0x1be   : > { %v772_v62 = vpop.f32.mrf.mxu1 }
 0x1c1   : > { %v267_v10 = vpop.permute.xlu2 %266 }
 0x1c2   : > { %v346_v46 = vadd.f32 %v323_v48, %v267_v10  ;;  %v347_v47 = vadd.f32 %v343_v16, %v267_v10 }
 0x1c3   : > { %v847_v55 = vpop.f32.mrf.mxu3 }
 0x1c4   : > { %v421_v20 = vadd.f32 %v398_v45, %v346_v46  ;;  %v422_v53 = vadd.f32 %v418_v44, %v347_v47  ;;  %v752_v41 = vpop.f32.mrf.mxu0 }
 0x1c5   : > { %v827_v57 = vpop.f32.mrf.mxu2 }
 0x1c6   : > { %v496_v56 = vadd.f32 %v473_v5, %v421_v20  ;;  %v497_v54 = vadd.f32 %v493_v52, %v422_v53  ;;  %v922_v3 = vpop.f32.mrf.mxu1 }
 0x1c8   : > { %v571_v63 = vadd.f32 %v548_v4, %v496_v56  ;;  %v572_v60 = vadd.f32 %v568_v49, %v497_v54 }
 0x1ca   : > { %v626_v61 = vadd.f32 %v622_v9, %v572_v60  ;;  %v625_v14 = vadd.f32 %v602_v19, %v571_v63 }
 0x1cb   : > { %v995_v15 = vpop.f32.mrf.mxu3 }
 0x1cc   : > { %v701_v50 = vadd.f32 %v697_v42, %v626_v61  ;;  %v700_v51 = vadd.f32 %v677_v43, %v625_v14  ;;  %v902_v58 = vpop.f32.mrf.mxu0 }
 0x1cd   : > { %v975_v2 = vpop.f32.mrf.mxu2 }
 0x1ce   : > { %v776_v59 = vadd.f32 %v772_v62, %v701_v50  ;;  %v775_v22 = vadd.f32 %v752_v41, %v700_v51 }
 0x1d0   : > { %v851_v21 = vadd.f32 %v847_v55, %v776_v59  ;;  %v850_v8 = vadd.f32 %v827_v57, %v775_v22 }
 0x1d2   : > { %v926_v26 = vadd.f32 %v922_v3, %v851_v21  ;;  %v925_v27 = vadd.f32 %v902_v58, %v850_v8 }
 0x1d4   : > { %v999_v17 = vadd.f32 %v995_v15, %v926_v26  ;;  %v998_v6 = vadd.f32 %v975_v2, %v925_v27 }
 0x1d9   : > { %v1137_v11 = vpop.f32.mrf.mxu3  ;;  %v1117_v12 = vpop.f32.mrf.mxu2 }
 0x1db   : > { %v1066_v13 = vpop.f32.mrf.mxu1  ;;  %v1046_v38 = vpop.f32.mrf.mxu0 }
 0x1dc   : > { %v1070_v7 = vadd.f32 %v1066_v13, %v999_v17  ;;  %v1069_v23 = vadd.f32 %v1046_v38, %v998_v6 }
 0x1de   : > { %v1141_v30 = vadd.f32 %v1137_v11, %v1070_v7  ;;  %v1140_v0 = vadd.f32 %v1117_v12, %v1069_v23 }
 0x1e2   : > { %v1262_v24 = vpop.f32.mrf.mxu3  ;;  %v1242_v25 = vpop.f32.mrf.mxu2 }
 0x1e3   : > { %v1208_v28 = vpop.f32.mrf.mxu1  ;;  %v1188_v29 = vpop.f32.mrf.mxu0 }
 0x1e4   : > { %v1212_v1 = vadd.f32 %v1208_v28, %v1141_v30  ;;  %v1211_v18 = vadd.f32 %v1188_v29, %v1140_v0 }
 0x1e6   : > { %v1266_v32 = vadd.f32 %v1262_v24, %v1212_v1  ;;  %v1265_v36 = vadd.f32 %v1242_v25, %v1211_v18 }
 0x211   : > { %v1404_v34 = vpop.f32.mrf.mxu3  ;;  %v1384_v33 = vpop.f32.mrf.mxu2 }
 0x213   : > { %v1333_v35 = vpop.f32.mrf.mxu1  ;;  %v1313_v31 = vpop.f32.mrf.mxu0 }
 0x214   : > { %v1337_v37 = vadd.f32 %v1333_v35, %v1266_v32  ;;  %v1336_v39 = vadd.f32 %v1313_v31, %v1265_v36 }
 0x216   : > { %v1408_v40 = vadd.f32 %v1404_v34, %v1337_v37  ;;  %v1407_v44 = vadd.f32 %v1384_v33, %v1336_v39 }
 0x231   : > { %v1526_v45 = vpop.f32.mrf.mxu2  ;;  %v1546_v16 = vpop.f32.mrf.mxu3 }
 0x233   : > { %v1455_v48 = vpop.f32.mrf.mxu0  ;;  %v1475_v49 = vpop.f32.mrf.mxu1 }
 0x234   : > { %v1478_v4 = vadd.f32 %v1455_v48, %v1407_v44  ;;  %v1479_v52 = vadd.f32 %v1475_v49, %v1408_v40 }
 0x236   : > { %v1549_v5 = vadd.f32 %v1526_v45, %v1478_v4  ;;  %v1550_v10 = vadd.f32 %v1546_v16, %v1479_v52 }
 0x238   : > { %v1552_v42 = vmax.f32 %v1550_v10, 0.0  ;;  %v1551_v43 = vmax.f32 %v1549_v5, 0.0 }
 0x23a   : > { %v1555_v46 = vrot.slane %v1552_v42, 4 }
 0x23c   : > { %v1556_v47 = vsel %vm299_vm3, %v1551_v43, %v1555_v46 }
 0x23d   : > { %1558 = vst [vmem:[%s257_s14] sm:$0xff] %v1556_v47 }
 0x23e   : > { %1887 = shalt.err (!%p1884_p7)
}
 0x23f   : > { %1775 = dma.vmem_to_hbm [thread:$0]  (%p2017_p11), %s1574_s29, 128, %s1576_s9, %s1560_s22  }
 0x240 PF: > { %s1587_s7 = sand.u32 1, %s1914_s18   ;;  %p2536_p5 = scmp.ge.s32.totalorder %s1926_s21, 2 }
 0x241   : > { %s1588_s15 = scalar_lea.sflag [#allocation4], %s1587_s7 }
 0x242   : > { %p1782_p8 = pnand %p2536_p5, %p2021_p12 }
 0x244   : > { %p1783_p10 = pneg %p1782_p8 }
 0x246   : > { %1909 = dma.done.wait (%p1783_p10), %s1588_s15, 128  }
 0x247   : > { %1911 = vsyncadd (%p1783_p10), %s1588_s15, 4294967168  ;;  %p18_p2 = scmp.ge.s32.totalorder %s1992_s24, 4   ;;  %s2537_s18 = smov %s1918_s19 }
 0x248   : > { %s2538_s19 = smov %s1922_s20  ;;  %s2539_s20 = smov %s2004_s27 }
 0x249   : > { %s2540_s21 = smov %s1992_s24  ;;  %20 = sbr.rel (!%p18_p2) target bundleno = 5 (0x5), region = 112 }
 0x24e   :  { %1594 = vsyncpa [#allocation3], 1 }
 0x24f   :  { %1596 = vsyncpa [#allocation3 + $0x1], 1 }
 0x250   :  { %1597 = vsyncpa [#allocation4], 1 }
 0x251   :  { %1599 = vsyncpa [#allocation4 + $0x1], 1 }

</bundles_post_ra>
